<compile_context>
chip_gen: v7x
topology: tpu7x:2x2x1
jax: 0.10.0
libtpu: 0.0.40
codegen_flags: <defaults>
</compile_context>

<pallas_src>
import functools

import jax
import jax.numpy as jnp
from jax.experimental import pallas as pl
from jax.experimental.pallas import tpu as pltpu


def _frelu_kernel(x_ref, w_ref, b_ref, cmask_ref, o_ref, *, K, H, W):
    """One grid step: a (rows, L) slab of flattened (n, c) planes.

    x_ref:     (rows, L)    VMEM, input dtype; each row is one (H, W) plane
                            flattened to L = H*W (lane-dense layout).
    w_ref:     (rows, K*K)  VMEM, f32 depthwise taps for this slab.
    b_ref:     (rows, 1)    VMEM, f32 bias for this slab.
    cmask_ref: (K, L)       VMEM, f32 {0,1} column-validity masks per dj.
    o_ref:     (rows, L)    VMEM, input dtype.
    """
    rows, L = x_ref.shape
    P = K // 2

    x_in = x_ref[...]                      # native dtype (kept for the max)
    x = x_in.astype(jnp.float32)           # f32 accumulation
    w = w_ref[...].astype(jnp.float32)     # (rows, K*K)
    cm = cmask_ref[...]                    # (K, L) f32 {0,1}

    # Flat position index.  The row-offset validity test needs no div/mod:
    #   0 <= row + di < H   <=>   0 <= p + di*W < L      (p = flat index)
    idx = jax.lax.broadcasted_iota(jnp.int32, (1, L), 1)

    # Accumulator starts at the bias (saves the separate +bias add).
    acc = jnp.broadcast_to(b_ref[...].astype(jnp.float32), (rows, L))

    for i in range(K):                     # kernel row, offset di = i - P
        di = i - P
        if di > 0:
            rowf = jnp.where(idx < L - di * W, 1.0, 0.0)
        elif di < 0:
            rowf = jnp.where(idx >= -di * W, 1.0, 0.0)
        else:
            rowf = None
        for j in range(K):                 # kernel col, offset dj = j - P
            dj = j - P
            colf = None if dj == 0 else cm[j:j + 1, :]          # (1, L)
            if rowf is None:
                maskf = colf
            elif colf is None:
                maskf = rowf
            else:
                maskf = rowf * colf                              # (1, L)

            s = di * W + dj
            sh = (-s) % L
            if sh == 0:
                shifted = x
            else:
                # XLU lane rotation on the flattened axis; positions whose
                # source wrapped around a plane/row edge are zeroed by maskf
                # below (that is where the conv zero-padding lives).
                shifted = pltpu.roll(x, shift=sh, axis=1)
            if maskf is not None:
                shifted = shifted * maskf          # (1,L) sublane broadcast

            tap = w[:, i * K + j:i * K + j + 1]    # (rows, 1) per-row tap
            acc = acc + shifted * tap              # lane broadcast of tap

    # Final max in the input dtype (bf16 VALU path on v6e/v7x; f32 unchanged).
    o_ref[...] = jnp.maximum(x_in, acc.astype(o_ref.dtype))


def _pick_rows_block(R, L, target_elems):
    """Largest row block that divides R, satisfies the (8,128) sublane rule
    (multiple of 8, or the full dim), and keeps the slab under target_elems."""
    valid = [r for r in range(1, R + 1)
             if R % r == 0 and (r % 8 == 0 or r == R)]
    fits = [r for r in valid if r * L <= target_elems]
    rb = max(fits) if fits else min(valid)
    # v7x megacore parity: keep at least 2 grid steps when a valid smaller
    # block exists (v5e/v6e are single-TC, so this is harmless there).
    if R // rb < 2:
        smaller = [r for r in valid if r < rb and R // r >= 2]
        if smaller:
            rb = max(smaller)
    return rb


def frelu(x_nchw, weight, bias, kernel_size, *, rows_block=None):
    """FReLU forward. x_nchw: (N, C, H, W); weight: (C, 1, K, K); bias: (C,)."""
    N, C, H, W = x_nchw.shape
    K = int(kernel_size)
    assert K % 2 == 1, "FReLU Pallas kernel assumes odd kernel_size (same-pad)"
    assert weight.shape == (C, 1, K, K) and bias.shape == (C,)
    L = H * W
    R = N * C
    dtype = x_nchw.dtype
    itemsize = jnp.dtype(dtype).itemsize
    P = K // 2

    # Lane-dense layout: every (n, c) plane becomes one length-L row.  These
    # are pure merges of contiguous dims (no transpose of the NCHW data).
    x_rows = x_nchw.reshape(R, L)

    # Per-row (i.e. per (n, c)) depthwise taps and bias, f32, blocked per slab.
    w_rows = jnp.tile(weight.reshape(C, K * K).astype(jnp.float32), (N, 1))
    b_rows = jnp.tile(bias.reshape(C, 1).astype(jnp.float32), (N, 1))

    # Column-validity masks (f32 0/1) for each column offset dj = j - P,
    # precomputed here so the kernel needs no vector div/mod.
    col = jnp.arange(L, dtype=jnp.int32) % W
    cmask = jnp.stack(
        [((col < W - dj) & (col >= -dj)) for dj in range(-P, P + 1)], axis=0
    ).astype(jnp.float32)                                  # (K, L)

    # Generation-aware block / VMEM budget.
    try:
        info = pltpu.get_tpu_info()
        vmem_cap = int(getattr(info, "vmem_capacity_bytes", 64 * 2**20))
    except Exception:  # interpret mode / query failure: be conservative
        vmem_cap = 64 * 2**20

    if vmem_cap > 64 * 2**20:          # v5e / v6e class (128 MiB physical)
        target_elems = 512 * 1024      # ~2 MiB f32 working slab per step
        vmem_budget = 96 * 2**20
    else:                              # v7x class (64 MiB per TensorCore)
        target_elems = 256 * 1024      # ~1 MiB f32 working slab per step
        vmem_budget = min(48 * 2**20, max(vmem_cap - 16 * 2**20, 16 * 2**20))

    if rows_block is None:
        rows_block = _pick_rows_block(R, L, target_elems)
    rows_block = int(rows_block)
    assert R % rows_block == 0 and (rows_block % 8 == 0 or rows_block == R)
    # TODO(synk): for very large planes (H*W*itemsize >> a few MiB) add an
    # L-strip grid axis with a (K//2)*W + K//2 halo instead of whole-plane rows.

    block_bytes = rows_block * L * itemsize
    f32_slab = rows_block * L * 4
    need = (4 * block_bytes            # in + out, double-buffered
            + 4 * f32_slab             # x_f32 / acc / shifted spill headroom
            + 2 * K * L * 4            # column-mask table
            + (2 << 20))               # headroom
    vmem_limit = int(min(vmem_budget, max(need, 16 * 2**20)))

    grid = (R // rows_block,)
    out = pl.pallas_call(
        functools.partial(_frelu_kernel, K=K, H=H, W=W),
        out_shape=jax.ShapeDtypeStruct((R, L), dtype),
        grid=grid,
        in_specs=[
            pl.BlockSpec((rows_block, L), lambda g: (g, 0)),
            pl.BlockSpec((rows_block, K * K), lambda g: (g, 0)),
            pl.BlockSpec((rows_block, 1), lambda g: (g, 0)),
            pl.BlockSpec((K, L), lambda g: (0, 0)),
        ],
        out_specs=pl.BlockSpec((rows_block, L), lambda g: (g, 0)),
        compiler_params=pltpu.CompilerParams(
            dimension_semantics=("parallel",),
            vmem_limit_bytes=vmem_limit),
    )(x_rows, w_rows, b_rows, cmask)
    return out.reshape(N, C, H, W)


def _reference_frelu(x_nchw, weight, bias, kernel_size):
    """Pure-JAX reference (depthwise conv via lax) for verification."""
    P = kernel_size // 2
    C = x_nchw.shape[1]
    depth = jax.lax.conv_general_dilated(
        x_nchw, weight,
        window_strides=(1, 1),
        padding=((P, P), (P, P)),
        feature_group_count=C,
        dimension_numbers=("NCHW", "OIHW", "NCHW"),
    ) + bias.reshape(1, C, 1, 1)
    return jnp.maximum(x_nchw, depth)


if __name__ == "__main__":
    N, C, H, W = 2, 4, 16, 16
    K = 3  # kernel_size; input_ch == output_ch == C (depthwise FReLU)

    key = jax.random.PRNGKey(0)
    kx, kw, kb = jax.random.split(key, 3)
    x = jax.random.normal(kx, (N, C, H, W), dtype=jnp.float32)
    # Deterministic synthetic Conv2d params: weight (C, 1, K, K), bias (C,)
    weight = 0.1 * jax.random.normal(kw, (C, 1, K, K), dtype=jnp.float32)
    bias = 0.1 * jax.random.normal(kb, (C,), dtype=jnp.float32)

    out = frelu(x, weight, bias, K)
    out = jax.block_until_ready(out)

    ref = _reference_frelu(x, weight, bias, K)
    assert out.shape == (N, C, H, W)
    assert out.dtype == x.dtype
    assert jnp.allclose(out, ref, atol=1e-5, rtol=1e-5), "mismatch vs reference"

    print("KERNEL_OK")
</pallas_src>

<mosaic_0001>
module attributes {stable_mosaic.version = 11 : i64} {
  func.func @_frelu_kernel(%arg0: i32, %arg1: memref<8x256xf32, #tpu.memory_space<vmem>>, %arg2: memref<8x9xf32, #tpu.memory_space<vmem>>, %arg3: memref<8x1xf32, #tpu.memory_space<vmem>>, %arg4: memref<3x256xf32, #tpu.memory_space<vmem>>, %arg5: memref<8x256xf32, #tpu.memory_space<vmem>>) attributes {dimension_semantics = [#tpu.dimension_semantics<parallel>], iteration_bounds = array<i64: 1>, scalar_prefetch = 0 : i64, scratch_operands = 0 : i64, tpu.core_type = #tpu.core_type<tc>, window_params = [{transform_indices = @transform_0, window_bounds = array<i64: 8, 256>}, {transform_indices = @transform_1, window_bounds = array<i64: 8, 9>}, {transform_indices = @transform_2, window_bounds = array<i64: 8, 1>}, {pipeline_mode = #tpu.pipeline_mode<synchronous>, transform_indices = @transform_3, window_bounds = array<i64: 3, 256>}, {transform_indices = @transform_4, window_bounds = array<i64: 8, 256>}]} {
    %c0 = arith.constant 0 : index
    %c0_0 = arith.constant 0 : index
    %0 = vector.load %arg1[%c0, %c0_0] : memref<8x256xf32, #tpu.memory_space<vmem>>, vector<8x256xf32>
    %c0_1 = arith.constant 0 : index
    %c0_2 = arith.constant 0 : index
    %1 = vector.load %arg2[%c0_1, %c0_2] : memref<8x9xf32, #tpu.memory_space<vmem>>, vector<8x9xf32>
    %c0_3 = arith.constant 0 : index
    %c0_4 = arith.constant 0 : index
    %2 = vector.load %arg4[%c0_3, %c0_4] : memref<3x256xf32, #tpu.memory_space<vmem>>, vector<3x256xf32>
    %3 = tpu.iota {dimensions = array<i32: 1>} : vector<1x256xi32>
    %c0_5 = arith.constant 0 : index
    %c0_6 = arith.constant 0 : index
    %4 = vector.load %arg3[%c0_5, %c0_6] : memref<8x1xf32, #tpu.memory_space<vmem>>, vector<8x1xf32>
    %5 = vector.shape_cast %4 : vector<8x1xf32> to vector<8x1xf32>
    %6 = vector.broadcast %5 : vector<8x1xf32> to vector<8x256xf32>
    %c16_i32 = arith.constant 16 : i32
    %7 = vector.broadcast %c16_i32 : i32 to vector<1x256xi32>
    %8 = arith.cmpi sge, %3, %7 : vector<1x256xi32>
    %cst = arith.constant 1.000000e+00 : f32
    %cst_7 = arith.constant 0.000000e+00 : f32
    %9 = vector.broadcast %cst : f32 to vector<1x256xf32>
    %10 = vector.broadcast %cst_7 : f32 to vector<1x256xf32>
    %11 = arith.select %8, %9, %10 : vector<1x256xi1>, vector<1x256xf32>
    %12 = vector.extract_strided_slice %2 {offsets = [0, 0], sizes = [1, 256], strides = [1, 1]} : vector<3x256xf32> to vector<1x256xf32>
    %13 = arith.mulf %11, %12 : vector<1x256xf32>
    %c17_i32 = arith.constant 17 : i32
    %14 = tpu.dynamic_rotate %0 by %c17_i32 dim 1 : vector<8x256xf32>, i32 -> vector<8x256xf32>
    %15 = vector.broadcast %13 : vector<1x256xf32> to vector<8x256xf32>
    %16 = arith.mulf %14, %15 : vector<8x256xf32>
    %17 = vector.extract_strided_slice %1 {offsets = [0, 0], sizes = [8, 1], strides = [1, 1]} : vector<8x9xf32> to vector<8x1xf32>
    %18 = vector.broadcast %17 : vector<8x1xf32> to vector<8x256xf32>
    %19 = arith.mulf %16, %18 : vector<8x256xf32>
    %20 = arith.addf %6, %19 : vector<8x256xf32>
    %c16_i32_8 = arith.constant 16 : i32
    %21 = tpu.dynamic_rotate %0 by %c16_i32_8 dim 1 : vector<8x256xf32>, i32 -> vector<8x256xf32>
    %22 = vector.broadcast %11 : vector<1x256xf32> to vector<8x256xf32>
    %23 = arith.mulf %21, %22 : vector<8x256xf32>
    %24 = vector.extract_strided_slice %1 {offsets = [0, 1], sizes = [8, 1], strides = [1, 1]} : vector<8x9xf32> to vector<8x1xf32>
    %25 = vector.broadcast %24 : vector<8x1xf32> to vector<8x256xf32>
    %26 = arith.mulf %23, %25 : vector<8x256xf32>
    %27 = arith.addf %20, %26 : vector<8x256xf32>
    %28 = vector.extract_strided_slice %2 {offsets = [2, 0], sizes = [1, 256], strides = [1, 1]} : vector<3x256xf32> to vector<1x256xf32>
    %29 = arith.mulf %11, %28 : vector<1x256xf32>
    %c15_i32 = arith.constant 15 : i32
    %30 = tpu.dynamic_rotate %0 by %c15_i32 dim 1 : vector<8x256xf32>, i32 -> vector<8x256xf32>
    %31 = vector.broadcast %29 : vector<1x256xf32> to vector<8x256xf32>
    %32 = arith.mulf %30, %31 : vector<8x256xf32>
    %33 = vector.extract_strided_slice %1 {offsets = [0, 2], sizes = [8, 1], strides = [1, 1]} : vector<8x9xf32> to vector<8x1xf32>
    %34 = vector.broadcast %33 : vector<8x1xf32> to vector<8x256xf32>
    %35 = arith.mulf %32, %34 : vector<8x256xf32>
    %36 = arith.addf %27, %35 : vector<8x256xf32>
    %37 = vector.extract_strided_slice %2 {offsets = [0, 0], sizes = [1, 256], strides = [1, 1]} : vector<3x256xf32> to vector<1x256xf32>
    %c1_i32 = arith.constant 1 : i32
    %38 = tpu.dynamic_rotate %0 by %c1_i32 dim 1 : vector<8x256xf32>, i32 -> vector<8x256xf32>
    %39 = vector.broadcast %37 : vector<1x256xf32> to vector<8x256xf32>
    %40 = arith.mulf %38, %39 : vector<8x256xf32>
    %41 = vector.extract_strided_slice %1 {offsets = [0, 3], sizes = [8, 1], strides = [1, 1]} : vector<8x9xf32> to vector<8x1xf32>
    %42 = vector.broadcast %41 : vector<8x1xf32> to vector<8x256xf32>
    %43 = arith.mulf %40, %42 : vector<8x256xf32>
    %44 = arith.addf %36, %43 : vector<8x256xf32>
    %45 = vector.extract_strided_slice %1 {offsets = [0, 4], sizes = [8, 1], strides = [1, 1]} : vector<8x9xf32> to vector<8x1xf32>
    %46 = vector.broadcast %45 : vector<8x1xf32> to vector<8x256xf32>
    %47 = arith.mulf %0, %46 : vector<8x256xf32>
    %48 = arith.addf %44, %47 : vector<8x256xf32>
    %49 = vector.extract_strided_slice %2 {offsets = [2, 0], sizes = [1, 256], strides = [1, 1]} : vector<3x256xf32> to vector<1x256xf32>
    %c255_i32 = arith.constant 255 : i32
    %50 = tpu.dynamic_rotate %0 by %c255_i32 dim 1 : vector<8x256xf32>, i32 -> vector<8x256xf32>
    %51 = vector.broadcast %49 : vector<1x256xf32> to vector<8x256xf32>
    %52 = arith.mulf %50, %51 : vector<8x256xf32>
    %53 = vector.extract_strided_slice %1 {offsets = [0, 5], sizes = [8, 1], strides = [1, 1]} : vector<8x9xf32> to vector<8x1xf32>
    %54 = vector.broadcast %53 : vector<8x1xf32> to vector<8x256xf32>
    %55 = arith.mulf %52, %54 : vector<8x256xf32>
    %56 = arith.addf %48, %55 : vector<8x256xf32>
    %c240_i32 = arith.constant 240 : i32
    %57 = vector.broadcast %c240_i32 : i32 to vector<1x256xi32>
    %58 = arith.cmpi slt, %3, %57 : vector<1x256xi32>
    %cst_9 = arith.constant 1.000000e+00 : f32
    %cst_10 = arith.constant 0.000000e+00 : f32
    %59 = vector.broadcast %cst_9 : f32 to vector<1x256xf32>
    %60 = vector.broadcast %cst_10 : f32 to vector<1x256xf32>
    %61 = arith.select %58, %59, %60 : vector<1x256xi1>, vector<1x256xf32>
    %62 = vector.extract_strided_slice %2 {offsets = [0, 0], sizes = [1, 256], strides = [1, 1]} : vector<3x256xf32> to vector<1x256xf32>
    %63 = arith.mulf %61, %62 : vector<1x256xf32>
    %c241_i32 = arith.constant 241 : i32
    %64 = tpu.dynamic_rotate %0 by %c241_i32 dim 1 : vector<8x256xf32>, i32 -> vector<8x256xf32>
    %65 = vector.broadcast %63 : vector<1x256xf32> to vector<8x256xf32>
    %66 = arith.mulf %64, %65 : vector<8x256xf32>
    %67 = vector.extract_strided_slice %1 {offsets = [0, 6], sizes = [8, 1], strides = [1, 1]} : vector<8x9xf32> to vector<8x1xf32>
    %68 = vector.broadcast %67 : vector<8x1xf32> to vector<8x256xf32>
    %69 = arith.mulf %66, %68 : vector<8x256xf32>
    %70 = arith.addf %56, %69 : vector<8x256xf32>
    %c240_i32_11 = arith.constant 240 : i32
    %71 = tpu.dynamic_rotate %0 by %c240_i32_11 dim 1 : vector<8x256xf32>, i32 -> vector<8x256xf32>
    %72 = vector.broadcast %61 : vector<1x256xf32> to vector<8x256xf32>
    %73 = arith.mulf %71, %72 : vector<8x256xf32>
    %74 = vector.extract_strided_slice %1 {offsets = [0, 7], sizes = [8, 1], strides = [1, 1]} : vector<8x9xf32> to vector<8x1xf32>
    %75 = vector.broadcast %74 : vector<8x1xf32> to vector<8x256xf32>
    %76 = arith.mulf %73, %75 : vector<8x256xf32>
    %77 = arith.addf %70, %76 : vector<8x256xf32>
    %78 = vector.extract_strided_slice %2 {offsets = [2, 0], sizes = [1, 256], strides = [1, 1]} : vector<3x256xf32> to vector<1x256xf32>
    %79 = arith.mulf %61, %78 : vector<1x256xf32>
    %c239_i32 = arith.constant 239 : i32
    %80 = tpu.dynamic_rotate %0 by %c239_i32 dim 1 : vector<8x256xf32>, i32 -> vector<8x256xf32>
    %81 = vector.broadcast %79 : vector<1x256xf32> to vector<8x256xf32>
    %82 = arith.mulf %80, %81 : vector<8x256xf32>
    %83 = vector.extract_strided_slice %1 {offsets = [0, 8], sizes = [8, 1], strides = [1, 1]} : vector<8x9xf32> to vector<8x1xf32>
    %84 = vector.broadcast %83 : vector<8x1xf32> to vector<8x256xf32>
    %85 = arith.mulf %82, %84 : vector<8x256xf32>
    %86 = arith.addf %77, %85 : vector<8x256xf32>
    %87 = arith.maximumf %0, %86 : vector<8x256xf32>
    %c0_12 = arith.constant 0 : index
    %c0_13 = arith.constant 0 : index
    %88 = vector.load %arg5[%c0_12, %c0_13] : memref<8x256xf32, #tpu.memory_space<vmem>>, vector<8x256xf32>
    tpu.vector_store %arg5[%c0_12, %c0_13], %87 {strides = array<i32>} : memref<8x256xf32, #tpu.memory_space<vmem>>, vector<8x256xf32>,
    return
  }
  func.func @transform_0(%arg0: i32) -> (i32, i32) {
    %c0_i32 = arith.constant 0 : i32
    %c0_i32_0 = arith.constant 0 : i32
    return %arg0, %c0_i32 : i32, i32
  }
  func.func @transform_1(%arg0: i32) -> (i32, i32) {
    %c0_i32 = arith.constant 0 : i32
    %c0_i32_0 = arith.constant 0 : i32
    return %arg0, %c0_i32 : i32, i32
  }
  func.func @transform_2(%arg0: i32) -> (i32, i32) {
    %c0_i32 = arith.constant 0 : i32
    %c0_i32_0 = arith.constant 0 : i32
    return %arg0, %c0_i32 : i32, i32
  }
  func.func @transform_3(%arg0: i32) -> (i32, i32) {
    %c0_i32 = arith.constant 0 : i32
    %c0_i32_0 = arith.constant 0 : i32
    %c0_i32_1 = arith.constant 0 : i32
    return %c0_i32, %c0_i32_0 : i32, i32
  }
  func.func @transform_4(%arg0: i32) -> (i32, i32) {
    %c0_i32 = arith.constant 0 : i32
    %c0_i32_0 = arith.constant 0 : i32
    return %arg0, %c0_i32 : i32, i32
  }
}

</mosaic_0001>

<bundles_post_ra>
// kernel: tpu_custom_call.1
= control target key start
LH: loop header
LB: loop body
LE: loop exit
PB: predicated region body
PF: predicated region fallthrough
CT: control target
= control target key end

     0   :  { %9 = vsyncpa [#allocation3], 0  ;;  %s544_s0 = inlined_call_operand.hbm [shape: f32[8,256], index: 0, kind: input, shape index: {}]   ;;  %s545_s1 = inlined_call_operand.vmem [shape: f32[8,9], index: 1, kind: input, shape index: {}]   ;;  %s546_s2 = inlined_call_operand.vmem [shape: f32[8,1], index: 2, kind: input, shape index: {}]   ;;  %s547_s3 = inlined_call_operand.vmem [shape: f32[3,256], index: 3, kind: input, shape index: {}]   ;;  %s548_s4 = inlined_call_operand.hbm [shape: f32[8,256], index: 4, kind: output, shape index: {}]  }
   0x1   :  { %10 = vsyncpa [#allocation4], 0  ;;  %s369_s15 = smov [#allocation2]   ;;  %s321_s19 = scalar_lea.hbm %s544_s0, 256 }
   0x2   :  { %s17_s16 = sshll.u32 %s369_s15, 4  ;;  %p322_p0 = scmp.ne.s32.totalorder %s544_s0, %s321_s19  ;;  %s18_s16 = int_to_ptr.vmem [resolvable:$true] %s17_s16 }
   0x3   :  { %p325_p1 = scmp.lt.u32.totalorder %s321_s19, %s544_s0 }
   0x5   :  { %p327_p2 = pnand %p325_p1, %p322_p0 }
   0x7   :  { %330 = shalt.err (!%p327_p2)
}
   0x8   :  { %s331_s24 = scalar_lea.vmem %s18_s16, 256  ;;  %p336_p4 = scmp.lt.s32.totalorder %s18_s16, %s18_s16 }
   0x9   :  { %p332_p3 = scmp.ne.s32.totalorder %s18_s16, %s331_s24  ;;  %p337_p5 = scmp.lt.s32.totalorder %s331_s24, %s331_s24 }
   0xb   :  { %p338_p6 = por %p337_p5, %p336_p4 }
   0xd   :  { %p339_p7 = pnand %p338_p6, %p332_p3 }
   0xf   :  { %342 = shalt.err (!%p339_p7)
}
  0x10   :  { %20 = dma.hbm_to_vmem [thread:$0]  %s544_s0, 256, %s18_s16, [#allocation3]  }
  0x11   :  { %365 = dma.done.wait [#allocation3], 256  }
  0x12   :  { %366 = vsyncadd [#allocation3], 4294967040  ;;  %v370_v0 = vmov 1   ;;  %v371_v1 = vmov 0   ;;  %v32_v2 = vld [vmem:[%s545_s1] sm:$0xff]  ;;  %s372_s0 = smov 17   ;;  %v34_v18 = vlaneseq }
  0x13   :  { %313 = vset.pattern.permute.xlu1 %v370_v0  ;;  %312 = vset.pattern.permute.xlu0 %v371_v1  ;;  %v37_v3 = vld [vmem:[%s546_s2] sm:$0xff]  ;;  %v373_v5 = vmov 2   ;;  %v435_v6 = vld [vmem:[#allocation2 + $0x8] sm:$0xff]  ;;  %v374_v7 = vmov 3   ;;  %s375_s1 = smov 16   ;;  %v376_v8 = vmov 6  }
  0x14   :  { %96 = vperm.xlu1 %313, %v32_v2   ;;  %79 = vperm.xlu0 %312, %v32_v2   ;;  %v432_v4 = vld [vmem:[#allocation2] sm:$0xff]  ;;  %s377_s2 = smov 15   ;;  %v378_v9 = vmov 4   ;;  %s379_s5 = smov 1   ;;  %v380_v10 = vmov 5   ;;  %v382_v11 = vmov 8  }
  0x15   :  { %s381_s6 = smov 127   ;;  %s383_s7 = smov 113   ;;  %v384_v12 = vmov 7   ;;  %v49_v21 = vshrl.u32 %v34_v18, 7  ;;  %v458_v22 = vand.u32 127, %v34_v18  ;;  %v387_v31 = vmov 0.0  }
  0x16   :  { %s385_s8 = smov 111   ;;  %s386_s9 = smov 112   ;;  %v33_v26 = vld [vmem:[%s547_s3] sm:$0x77] }
  0x17   :  { %v460_v25 = vsub.s32 0, %v49_v21  ;;  %vm43_vm0 = vcmp.ge.s32.totalorder %v458_v22, 16  ;;  %v54_v30 = vsub.s32 4, %v49_v21  ;;  %v469_v33 = vsub.s32 2, %v49_v21  ;;  %s388_s3 = smov [#allocation5]  }
  0x18   :  { %40 = vperm.xlu0 %312, %v37_v3   ;;  %60 = vrot.lane.b32.xlu1 %v432_v4, %s372_s0  ;;  %v45_v32 = vsel %vm43_vm0, 1.0, %v387_v31  ;;  %vm64_vm1 = vcmp.lt.s32.totalorder %v458_v22, 17  ;;  %v109_v39 = vsub.s32 6, %v49_v21  ;;  %vm90_vm2 = vcmp.lt.s32.totalorder %v458_v22, 16  ;;  %s283_s12 = sshll.u32 %s388_s3, 4  ;;  %s284_s12 = int_to_ptr.vmem [resolvable:$true] %s283_s12 }
  0x19   :  { %314 = vset.pattern.permute.xlu1 %v373_v5  ;;  %v51_v29 = vrot.slane %v33_v26, %v460_v25  ;;  %v55_v35 = vrot.slane %v33_v26, %v54_v30  ;;  %v474_v38 = vrot.slane %v33_v26, %v469_v33  ;;  %v36_v45 = vadd.s32 128, %v458_v22  ;;  %s343_s13 = scalar_lea.vmem %s284_s12, 256  ;;  %p348_p9 = scmp.lt.s32.totalorder %s284_s12, %s284_s12 }
  0x1a   :  { %v110_v47 = vrot.slane %v33_v26, %v109_v39  ;;  %vm119_vm3 = vcmp.lt.s32.totalorder %v458_v22, 15  ;;  %vm144_vm4 = vcmp.lt.s32.totalorder %v458_v22, 1  ;;  %vm177_vm6 = vcmp.lt.s32.totalorder %v458_v22, 127  ;;  %p344_p8 = scmp.ne.s32.totalorder %s284_s12, %s343_s13  ;;  %p349_p10 = scmp.lt.s32.totalorder %s343_s13, %s343_s13 }
  0x1b   :  { %v58_v36 = vmul.f32 %v51_v29, %v45_v32  ;;  %v74_v42 = vrot.slane %v55_v35, %v460_v25  ;;  %v113_v44 = vmul.f32 %v474_v38, %v45_v32  ;;  %vm199_vm5 = vcmp.lt.s32.totalorder %v36_v45, 240 }
  0x1c   :  { %133 = vperm.xlu1 %314, %v32_v2   ;;  %62 = vrot.lane.b32.xlu0 %v435_v6, %s372_s0  ;;  %v129_v54 = vrot.slane %v110_v47, %v460_v25  ;;  %v150_v59 = vrot.slane %v51_v29, %v460_v25  ;;  %v201_v63 = vsel %vm199_vm5, 1.0, %v387_v31  ;;  %v183_v21 = vrot.slane %v474_v38, %v469_v33  ;;  %p350_p11 = por %p349_p10, %p348_p9 }
  0x1d   :  { %315 = vset.pattern.permute.xlu0 %v374_v7  ;;  %v70_v41 = vrot.slane %v58_v36, %v460_v25  ;;  %v125_v53 = vrot.slane %v113_v44, %v460_v25  ;;  %vm208_vm7 = vcmp.lt.s32.totalorder %v458_v22, 113  ;;  %vm233_vm8 = vcmp.lt.s32.totalorder %v458_v22, 112 }
  0x1e   :  { %vm252_vm9 = vcmp.lt.s32.totalorder %v458_v22, 111  ;;  %p351_p12 = pnand %p350_p11, %p344_p8 }
  0x20   :  { %88 = vrot.lane.b32.xlu1 %v435_v6, %s375_s1  ;;  %86 = vrot.lane.b32.xlu0 %v432_v4, %s375_s1 }
  0x21   :  { %318 = vset.pattern.permute.xlu1 %v376_v8 }
  0x24   :  { %115 = vrot.lane.b32.xlu1 %v432_v4, %s377_s2  ;;  %158 = vperm.xlu0 %315, %v32_v2  }
  0x28   :  { %117 = vrot.lane.b32.xlu1 %v435_v6, %s377_s2  ;;  %316 = vset.pattern.permute.xlu0 %v378_v9 }
  0x29   :  { %166 = vperm.xlu0 %316, %v32_v2  }
  0x2c   :  { %140 = vrot.lane.b32.xlu1 %v432_v4, %s379_s5 }
  0x2d   :  { %317 = vset.pattern.permute.xlu0 %v380_v10 }
  0x2e   :  { %191 = vperm.xlu0 %317, %v32_v2  }
  0x30   :  { %142 = vrot.lane.b32.xlu1 %v435_v6, %s379_s5 }
  0x32   :  { %175 = vrot.lane.b32.xlu0 %v435_v6, %s381_s6 }
  0x33   :  { %320 = vset.pattern.permute.xlu0 %v382_v11 }
  0x34   :  { %222 = vperm.xlu1 %318, %v32_v2  }
  0x36   :  { %204 = vrot.lane.b32.xlu0 %v432_v4, %s383_s7 }
  0x38   :  { %173 = vrot.lane.b32.xlu1 %v432_v4, %s381_s6 }
  0x39   :  { %319 = vset.pattern.permute.xlu1 %v384_v12 }
  0x3a   :  { %266 = vperm.xlu0 %320, %v32_v2  }
  0x3c   :  { %239 = vperm.xlu1 %319, %v32_v2  }
  0x3e   :  { %248 = vrot.lane.b32.xlu0 %v432_v4, %s385_s8 }
  0x40   :  { %206 = vrot.lane.b32.xlu1 %v435_v6, %s383_s7 }
  0x44   :  { %229 = vrot.lane.b32.xlu1 %v432_v4, %s386_s9 }
  0x48   :  { %231 = vrot.lane.b32.xlu1 %v435_v6, %s386_s9 }
  0x4c   :  { %250 = vrot.lane.b32.xlu1 %v435_v6, %s385_s8 }
  0x93   :  { %v452_v13 = vpop.permute.xlu1 %96  ;;  %v80_v14 = vpop.permute.xlu0 %79 }
  0x97   :  { %v454_v15 = vpop.permute.xlu0 %40  ;;  %v61_v16 = vpop.permute.xlu1 %60 }
  0x9b   :  { %v456_v17 = vpop.permute.xlu1 %133  ;;  %v63_v19 = vpop.permute.xlu0 %62 }
  0x9c   :  { %v65_v43 = vsel %vm64_vm1, %v61_v16, %v63_v19  ;;  %v66_v46 = vsel %vm64_vm1, %v63_v19, %v61_v16  ;;  %v203_v16 = vmul.f32 %v201_v63, %v55_v35 }
  0x9d   :  { %v76_v50 = vmul.f32 %v74_v42, %v65_v43  ;;  %v75_v52 = vmul.f32 %v70_v41, %v66_v46  ;;  %v247_v43 = vmul.f32 %v201_v63, %v110_v47 }
  0x9e   :  { %v218_v30 = vrot.slane %v203_v16, %v460_v25 }
  0x9f   :  { %v89_v20 = vpop.permute.xlu1 %88  ;;  %v87_v23 = vpop.permute.xlu0 %86  ;;  %v83_v60 = vmul.f32 %v80_v14, %v76_v50  ;;  %v82_v0 = vmul.f32 %v80_v14, %v75_v52 }
  0xa0   :  { %v92_v51 = vsel %vm90_vm2, %v89_v20, %v87_v23  ;;  %v91_v1 = vsel %vm90_vm2, %v87_v23, %v89_v20  ;;  %v187_v23 = vrot.slane %v110_v47, %v469_v33  ;;  %v262_v47 = vrot.slane %v247_v43, %v460_v25 }
  0xa1   :  { %v93_v57 = vmul.f32 %v92_v51, %v45_v32  ;;  %v85_v10 = vadd.f32 %v83_v60, %v454_v15  ;;  %v100_v11 = vmul.f32 %v452_v13, %v91_v1  ;;  %v84_v14 = vadd.f32 %v82_v0, %v454_v15 }
  0xa3   :  { %v116_v24 = vpop.permute.xlu1 %115  ;;  %v466_v27 = vpop.permute.xlu0 %158  ;;  %v99_v8 = vmul.f32 %v452_v13, %v93_v57  ;;  %v102_v29 = vadd.f32 %v100_v11, %v85_v10 }
  0xa5   :  { %v101_v26 = vadd.f32 %v99_v8, %v84_v14 }
  0xa7   :  { %v118_v28 = vpop.permute.xlu1 %117 }
  0xa8   :  { %v471_v37 = vpop.permute.xlu0 %166  ;;  %v121_v55 = vsel %vm119_vm3, %v118_v28, %v116_v24  ;;  %v120_v58 = vsel %vm119_vm3, %v116_v24, %v118_v28 }
  0xa9   :  { %v130_v2 = vmul.f32 %v125_v53, %v121_v55  ;;  %v131_v5 = vmul.f32 %v129_v54, %v120_v58  ;;  %v169_v41 = vmul.f32 %v471_v37, %v432_v4  ;;  %v258_v53 = vrot.slane %v474_v38, %v460_v25 }
  0xab   :  { %v141_v34 = vpop.permute.xlu1 %140  ;;  %v136_v18 = vmul.f32 %v456_v17, %v130_v2  ;;  %v137_v19 = vmul.f32 %v456_v17, %v131_v5 }
  0xad   :  { %v482_v48 = vpop.permute.xlu0 %191  ;;  %v138_v31 = vadd.f32 %v136_v18, %v101_v26 }
  0xaf   :  { %v143_v40 = vpop.permute.xlu1 %142 }
  0xb0   :  { %v146_v61 = vsel %vm144_vm4, %v143_v40, %v141_v34  ;;  %v145_v3 = vsel %vm144_vm4, %v141_v34, %v143_v40  ;;  %v139_v34 = vadd.f32 %v137_v19, %v102_v29 }
  0xb1   :  { %v176_v62 = vpop.permute.xlu0 %175  ;;  %v155_v9 = vmul.f32 %v150_v59, %v146_v61  ;;  %v156_v12 = vmul.f32 %v145_v3, %v74_v42 }
  0xb3   :  { %v484_v49 = vpop.permute.xlu1 %222  ;;  %v161_v13 = vmul.f32 %v466_v27, %v155_v9  ;;  %v162_v17 = vmul.f32 %v466_v27, %v156_v12  ;;  %v170_v27 = vmul.f32 %v471_v37, %v435_v6 }
  0xb5   :  { %v205_v20 = vpop.permute.xlu0 %204  ;;  %v163_v42 = vadd.f32 %v161_v13, %v138_v31  ;;  %v164_v44 = vadd.f32 %v162_v17, %v139_v34 }
  0xb7   :  { %v174_v56 = vpop.permute.xlu1 %173  ;;  %v171_v54 = vadd.f32 %v169_v41, %v163_v42  ;;  %v172_v57 = vadd.f32 %v170_v27, %v164_v44 }
  0xb8   :  { %v178_v28 = vsel %vm177_vm6, %v174_v56, %v176_v62  ;;  %v179_v15 = vsel %vm177_vm6, %v176_v62, %v174_v56 }
  0xb9   :  { %v188_v35 = vmul.f32 %v183_v21, %v178_v28  ;;  %v189_v36 = vmul.f32 %v187_v23, %v179_v15  ;;  %v267_v40 = vpop.permute.xlu0 %266 }
  0xbb   :  { %v240_v7 = vpop.permute.xlu1 %239  ;;  %v194_v50 = vmul.f32 %v482_v48, %v188_v35  ;;  %v195_v51 = vmul.f32 %v482_v48, %v189_v36 }
  0xbd   :  { %v249_v60 = vpop.permute.xlu0 %248  ;;  %v196_v61 = vadd.f32 %v194_v50, %v171_v54  ;;  %v197_v48 = vadd.f32 %v195_v51, %v172_v57 }
  0xbf   :  { %v207_v24 = vpop.permute.xlu1 %206 }
  0xc0   :  { %v209_v32 = vsel %vm208_vm7, %v205_v20, %v207_v24  ;;  %v210_v33 = vsel %vm208_vm7, %v207_v24, %v205_v20 }
  0xc1   :  { %v219_v45 = vmul.f32 %v209_v32, %v150_v59  ;;  %v220_v46 = vmul.f32 %v218_v30, %v210_v33 }
  0xc3   :  { %v230_v39 = vpop.permute.xlu1 %229  ;;  %v225_v37 = vmul.f32 %v484_v49, %v219_v45  ;;  %v226_v58 = vmul.f32 %v484_v49, %v220_v46 }
  0xc5   :  { %v228_v3 = vadd.f32 %v226_v58, %v197_v48  ;;  %v227_v25 = vadd.f32 %v225_v37, %v196_v61 }
  0xc7   :  { %v232_v52 = vpop.permute.xlu1 %231 }
  0xc8   :  { %v234_v55 = vsel %vm233_vm8, %v230_v39, %v232_v52  ;;  %v235_v56 = vsel %vm233_vm8, %v232_v52, %v230_v39 }
  0xc9   :  { %v237_v59 = vmul.f32 %v235_v56, %v201_v63  ;;  %v242_v62 = vmul.f32 %v240_v7, %v234_v55 }
  0xcb   :  { %v243_v0 = vmul.f32 %v240_v7, %v237_v59  ;;  %v251_v1 = vpop.permute.xlu1 %250  ;;  %v244_v9 = vadd.f32 %v242_v62, %v227_v25 }
  0xcc   :  { %v253_v38 = vsel %vm252_vm9, %v249_v60, %v251_v1  ;;  %v254_v2 = vsel %vm252_vm9, %v251_v1, %v249_v60 }
  0xcd   :  { %v263_v5 = vmul.f32 %v258_v53, %v253_v38  ;;  %v264_v8 = vmul.f32 %v262_v47, %v254_v2  ;;  %v245_v10 = vadd.f32 %v243_v0, %v228_v3 }
  0xcf   :  { %v269_v49 = vmul.f32 %v267_v40, %v263_v5  ;;  %v270_v63 = vmul.f32 %v267_v40, %v264_v8 }
  0xd1   :  { %v271_v11 = vadd.f32 %v269_v49, %v244_v9  ;;  %v272_v12 = vadd.f32 %v270_v63, %v245_v10 }
  0xd3   :  { %v273_v7 = vmax.f32 %v432_v4, %v271_v11  ;;  %v274_v16 = vmax.f32 %v435_v6, %v272_v12 }
  0xd5   :  { %275 = vst [vmem:[#allocation5] sm:$0xff] %v273_v7  ;;  %276 = vst [vmem:[#allocation5 + $0x8] sm:$0xff] %v274_v16 }
  0xd6   :  { %354 = shalt.err (!%p351_p12)
}
  0xd7   :  { %s355_s16 = scalar_lea.hbm %s548_s4, 256 }
  0xd8   :  { %p356_p13 = scmp.ne.s32.totalorder %s548_s4, %s355_s16  ;;  %p359_p0 = scmp.lt.u32.totalorder %s355_s16, %s548_s4 }
  0xda   :  { %p361_p1 = pnand %p359_p0, %p356_p13 }
  0xdc   :  { %364 = shalt.err (!%p361_p1)
}
  0xdd   :  { %286 = dma.vmem_to_hbm [thread:$0]  %s284_s12, 256, %s548_s4, [#allocation4]  }
  0xde   :  { %367 = dma.done.wait [#allocation4], 256  }
  0xdf   :  { %368 = vsyncadd [#allocation4], 4294967040 }
  0xe0   :  { %290 = vsyncpa [#allocation3], 1 }
  0xe1   :  { %291 = vsyncpa [#allocation4], 1 }

</bundles_post_ra>
